<compile_context>
chip_gen: v5e
topology: v5e:2x2
jax: 0.10.0
libtpu: 0.0.40
codegen_flags: <defaults>
</compile_context>

<pallas_src>
import jax
import jax.numpy as jnp
from jax.experimental import pallas as pl
from jax.experimental.pallas import tpu as pltpu

EPS = 1e-5


def _resnet_kernel(x_ref, w1_ref, c1_ref, w2_ref, c2_ref, o_ref):
    x = x_ref[...]                                   # (C, TL)  (batch dim squeezed)

    # Layer 1: folded Conv1d+BN, then ReLU
    h = jnp.dot(w1_ref[...], x, preferred_element_type=jnp.float32)
    h = jnp.maximum(h + c1_ref[...], 0.0)            # (C,1) broadcasts over lanes

    # Layer 2: folded Conv1d+BN, then ReLU
    h = jnp.dot(w2_ref[...], h, preferred_element_type=jnp.float32)
    h = jnp.maximum(h + c2_ref[...], 0.0)

    # Residual + final ReLU (single fused store expression)
    o_ref[...] = jnp.maximum(x.astype(jnp.float32) + h, 0.0).astype(o_ref.dtype)


def _fold_params(params, C):
    """Fold conv bias + BN (running stats) into the conv weights. Plain JAX glue."""
    def fold(W, b, g, be, m, v):
        s = g / jnp.sqrt(v + EPS)                    # BN scale
        t = be - m * s                               # BN shift
        Wf = s[:, None] * W                          # (C, C)
        cf = (s * b + t).reshape(C, 1)               # (C, 1)
        return Wf.astype(jnp.float32), cf.astype(jnp.float32)

    W1f, c1 = fold(params["W1"], params["b1"], params["g1"], params["be1"],
                   params["m1"], params["v1"])
    W2f, c2 = fold(params["W2"], params["b2"], params["g2"], params["be2"],
                   params["m2"], params["v2"])
    return W1f, c1, W2f, c2


def pointwise_resnet1d(x, params, *, tile_l=None):
    """x: (B, C, L) float32. params: dict of conv/bn parameters."""
    B, C, L = x.shape

    # --- choose a lane tile: largest 128-multiple under a conservative VMEM
    #     budget (in + out blocks, double-buffered), capped at 2048.  This
    #     budget (~8 MiB) is well below the scoped VMEM default on every
    #     generation (v5e/v6e: 128 MiB physical, v7x: 64 MiB). ---
    if tile_l is None:
        budget_bytes = 8 << 20
        per_lane_bytes = 2 * 2 * C * 4               # (in + out) x double-buffer x f32
        by_vmem = (budget_bytes // per_lane_bytes) // 128 * 128
        tile_l = int(max(128, min(2048, by_vmem)))
    assert tile_l % 128 == 0, "tile_l must be lane-aligned (multiple of 128)"

    # Don't exceed the (128-padded) row length; pad L to a tile multiple.
    l_pad128 = -(-L // 128) * 128
    tile_l = min(tile_l, l_pad128)
    L_pad = -(-L // tile_l) * tile_l
    x_in = x if L_pad == L else jnp.pad(x, ((0, 0), (0, 0), (0, L_pad - L)))

    W1f, c1, W2f, c2 = _fold_params(params, C)

    mat_spec = pl.BlockSpec((C, C), lambda b, l: (0, 0))
    vec_spec = pl.BlockSpec((C, 1), lambda b, l: (0, 0))

    out = pl.pallas_call(
        _resnet_kernel,
        out_shape=jax.ShapeDtypeStruct((B, C, L_pad), x.dtype),
        grid_spec=pltpu.PrefetchScalarGridSpec(
            num_scalar_prefetch=0,
            grid=(B, L_pad // tile_l),
            in_specs=[
                pl.BlockSpec((pl.Squeezed(), C, tile_l), lambda b, l: (b, 0, l)),  # x
                mat_spec, vec_spec,                                                # layer 1
                mat_spec, vec_spec,                                                # layer 2
            ],
            out_specs=pl.BlockSpec((pl.Squeezed(), C, tile_l),
                                   lambda b, l: (b, 0, l)),
        ),
        compiler_params=pltpu.CompilerParams(
            dimension_semantics=("parallel", "parallel")),
    )(x_in, W1f, c1, W2f, c2)

    return out if L_pad == L else out[:, :, :L]


def reference_forward(x, p):
    """Pure-JAX reference matching PyTorch eval-mode forward."""
    def conv(y, W, b):
        return jnp.einsum("oi,bil->bol", W, y) + b[None, :, None]

    def bn(y, g, be, m, v):
        return (y - m[None, :, None]) / jnp.sqrt(v[None, :, None] + EPS) \
            * g[None, :, None] + be[None, :, None]

    h = jax.nn.relu(bn(conv(x, p["W1"], p["b1"]), p["g1"], p["be1"], p["m1"], p["v1"]))
    h = jax.nn.relu(bn(conv(h, p["W2"], p["b2"]), p["g2"], p["be2"], p["m2"], p["v2"]))
    return jax.nn.relu(x + h)


def make_params(key, C):
    ks = jax.random.split(key, 12)
    f32 = jnp.float32
    return {
        "W1": 0.2 * jax.random.normal(ks[0], (C, C), f32),
        "b1": 0.1 * jax.random.normal(ks[1], (C,), f32),
        "g1": 1.0 + 0.1 * jax.random.normal(ks[2], (C,), f32),
        "be1": 0.1 * jax.random.normal(ks[3], (C,), f32),
        "m1": 0.1 * jax.random.normal(ks[4], (C,), f32),
        "v1": 0.5 + jnp.abs(jax.random.normal(ks[5], (C,), f32)),
        "W2": 0.2 * jax.random.normal(ks[6], (C, C), f32),
        "b2": 0.1 * jax.random.normal(ks[7], (C,), f32),
        "g2": 1.0 + 0.1 * jax.random.normal(ks[8], (C,), f32),
        "be2": 0.1 * jax.random.normal(ks[9], (C,), f32),
        "m2": 0.1 * jax.random.normal(ks[10], (C,), f32),
        "v2": 0.5 + jnp.abs(jax.random.normal(ks[11], (C,), f32)),
    }


if __name__ == "__main__":
    key = jax.random.PRNGKey(0)
    kx, kp = jax.random.split(key)

    B, C, L = 2, 8, 256                         # small shapes, NCL layout
    params = make_params(kp, C)

    # Case 1: L is a tile multiple.
    x = jax.random.normal(kx, (B, C, L), jnp.float32)
    out = jax.block_until_ready(pointwise_resnet1d(x, params))
    ref = reference_forward(x, params)
    assert out.shape == (B, C, L)
    assert jnp.allclose(out, ref, atol=1e-5, rtol=1e-5), \
        f"max err {jnp.max(jnp.abs(out - ref))}"

    # Case 2: ragged L (exercises the pad/slice path).
    Lr = 200
    xr = jax.random.normal(kx, (B, C, Lr), jnp.float32)
    outr = jax.block_until_ready(pointwise_resnet1d(xr, params))
    refr = reference_forward(xr, params)
    assert outr.shape == (B, C, Lr)
    assert jnp.allclose(outr, refr, atol=1e-5, rtol=1e-5), \
        f"max err {jnp.max(jnp.abs(outr - refr))}"

    print("KERNEL_OK")
</pallas_src>

<mosaic_0001>
module attributes {stable_mosaic.version = 11 : i64} {
  func.func @_resnet_kernel(%arg0: i32, %arg1: i32, %arg2: memref<1x8x256xf32, #tpu.memory_space<vmem>>, %arg3: memref<8x8xf32, #tpu.memory_space<vmem>>, %arg4: memref<8x1xf32, #tpu.memory_space<vmem>>, %arg5: memref<8x8xf32, #tpu.memory_space<vmem>>, %arg6: memref<8x1xf32, #tpu.memory_space<vmem>>, %arg7: memref<1x8x256xf32, #tpu.memory_space<vmem>>) attributes {dimension_semantics = [#tpu.dimension_semantics<parallel>, #tpu.dimension_semantics<parallel>], iteration_bounds = array<i64: 2, 1>, scalar_prefetch = 0 : i64, scratch_operands = 0 : i64, tpu.core_type = #tpu.core_type<tc>, window_params = [{transform_indices = @transform_0, window_bounds = array<i64: 1, 8, 256>}, {pipeline_mode = #tpu.pipeline_mode<synchronous>, transform_indices = @transform_1, window_bounds = array<i64: 8, 8>}, {pipeline_mode = #tpu.pipeline_mode<synchronous>, transform_indices = @transform_2, window_bounds = array<i64: 8, 1>}, {pipeline_mode = #tpu.pipeline_mode<synchronous>, transform_indices = @transform_3, window_bounds = array<i64: 8, 8>}, {pipeline_mode = #tpu.pipeline_mode<synchronous>, transform_indices = @transform_4, window_bounds = array<i64: 8, 1>}, {transform_indices = @transform_5, window_bounds = array<i64: 1, 8, 256>}]} {
    %c0 = arith.constant 0 : index
    %c0_0 = arith.constant 0 : index
    %c0_1 = arith.constant 0 : index
    %0 = vector.load %arg2[%c0, %c0_0, %c0_1] : memref<1x8x256xf32, #tpu.memory_space<vmem>>, vector<1x8x256xf32>
    %1 = vector.shape_cast %0 : vector<1x8x256xf32> to vector<8x256xf32>
    %c0_2 = arith.constant 0 : index
    %c0_3 = arith.constant 0 : index
    %2 = vector.load %arg3[%c0_2, %c0_3] : memref<8x8xf32, #tpu.memory_space<vmem>>, vector<8x8xf32>
    %cst = arith.constant dense<0.000000e+00> : vector<8x256xf32>
    %3 = tpu.matmul %2, %1, %cst {dimension_numbers = #tpu.dot_dimension_numbers<[1], [0], [0], [1], [0, 0, 1, 1], [], []>} : vector<8x8xf32>, vector<8x256xf32>, vector<8x256xf32> -> vector<8x256xf32>
    %c0_4 = arith.constant 0 : index
    %c0_5 = arith.constant 0 : index
    %4 = vector.load %arg4[%c0_4, %c0_5] : memref<8x1xf32, #tpu.memory_space<vmem>>, vector<8x1xf32>
    %5 = vector.broadcast %4 : vector<8x1xf32> to vector<8x256xf32>
    %6 = arith.addf %3, %5 : vector<8x256xf32>
    %cst_6 = arith.constant 0.000000e+00 : f32
    %7 = vector.broadcast %cst_6 : f32 to vector<8x256xf32>
    %8 = arith.maximumf %6, %7 : vector<8x256xf32>
    %c0_7 = arith.constant 0 : index
    %c0_8 = arith.constant 0 : index
    %9 = vector.load %arg5[%c0_7, %c0_8] : memref<8x8xf32, #tpu.memory_space<vmem>>, vector<8x8xf32>
    %cst_9 = arith.constant dense<0.000000e+00> : vector<8x256xf32>
    %10 = tpu.matmul %9, %8, %cst_9 {dimension_numbers = #tpu.dot_dimension_numbers<[1], [0], [0], [1], [0, 0, 1, 1], [], []>} : vector<8x8xf32>, vector<8x256xf32>, vector<8x256xf32> -> vector<8x256xf32>
    %c0_10 = arith.constant 0 : index
    %c0_11 = arith.constant 0 : index
    %11 = vector.load %arg6[%c0_10, %c0_11] : memref<8x1xf32, #tpu.memory_space<vmem>>, vector<8x1xf32>
    %12 = vector.broadcast %11 : vector<8x1xf32> to vector<8x256xf32>
    %13 = arith.addf %10, %12 : vector<8x256xf32>
    %cst_12 = arith.constant 0.000000e+00 : f32
    %14 = vector.broadcast %cst_12 : f32 to vector<8x256xf32>
    %15 = arith.maximumf %13, %14 : vector<8x256xf32>
    %16 = arith.addf %1, %15 : vector<8x256xf32>
    %cst_13 = arith.constant 0.000000e+00 : f32
    %17 = vector.broadcast %cst_13 : f32 to vector<8x256xf32>
    %18 = arith.maximumf %16, %17 : vector<8x256xf32>
    %c0_14 = arith.constant 0 : index
    %c0_15 = arith.constant 0 : index
    %c0_16 = arith.constant 0 : index
    %19 = vector.load %arg7[%c0_14, %c0_15, %c0_16] : memref<1x8x256xf32, #tpu.memory_space<vmem>>, vector<1x8x256xf32>
    %20 = vector.shape_cast %19 : vector<1x8x256xf32> to vector<8x256xf32>
    %21 = vector.shape_cast %18 : vector<8x256xf32> to vector<1x8x256xf32>
    tpu.vector_store %arg7[%c0_14, %c0_15, %c0_16], %21 {strides = array<i32>} : memref<1x8x256xf32, #tpu.memory_space<vmem>>, vector<1x8x256xf32>,
    return
  }
  func.func @transform_0(%arg0: i32, %arg1: i32) -> (i32, i32, i32) {
    %c0_i32 = arith.constant 0 : i32
    %c0_i32_0 = arith.constant 0 : i32
    return %arg0, %c0_i32, %arg1 : i32, i32, i32
  }
  func.func @transform_1(%arg0: i32, %arg1: i32) -> (i32, i32) {
    %c0_i32 = arith.constant 0 : i32
    %c0_i32_0 = arith.constant 0 : i32
    %c0_i32_1 = arith.constant 0 : i32
    return %c0_i32, %c0_i32_0 : i32, i32
  }
  func.func @transform_2(%arg0: i32, %arg1: i32) -> (i32, i32) {
    %c0_i32 = arith.constant 0 : i32
    %c0_i32_0 = arith.constant 0 : i32
    %c0_i32_1 = arith.constant 0 : i32
    return %c0_i32, %c0_i32_0 : i32, i32
  }
  func.func @transform_3(%arg0: i32, %arg1: i32) -> (i32, i32) {
    %c0_i32 = arith.constant 0 : i32
    %c0_i32_0 = arith.constant 0 : i32
    %c0_i32_1 = arith.constant 0 : i32
    return %c0_i32, %c0_i32_0 : i32, i32
  }
  func.func @transform_4(%arg0: i32, %arg1: i32) -> (i32, i32) {
    %c0_i32 = arith.constant 0 : i32
    %c0_i32_0 = arith.constant 0 : i32
    %c0_i32_1 = arith.constant 0 : i32
    return %c0_i32, %c0_i32_0 : i32, i32
  }
  func.func @transform_5(%arg0: i32, %arg1: i32) -> (i32, i32, i32) {
    %c0_i32 = arith.constant 0 : i32
    %c0_i32_0 = arith.constant 0 : i32
    return %arg0, %c0_i32, %arg1 : i32, i32, i32
  }
}

</mosaic_0001>

<bundles_post_ra>
// kernel: tpu_custom_call.1
= control target key start
LH: loop header
LB: loop body
LE: loop exit
PB: predicated region body
PF: predicated region fallthrough
CT: control target
= control target key end

     0   :  { %10 = vsyncpa [#allocation3], 0  ;;  %s849_s0 = inlined_call_operand.hbm [shape: f32[2,8,256], index: 0, kind: input, shape index: {}]   ;;  %s850_s1 = inlined_call_operand.vmem [shape: f32[8,8], index: 1, kind: input, shape index: {}]   ;;  %s851_s2 = inlined_call_operand.vmem [shape: f32[8,1], index: 2, kind: input, shape index: {}]   ;;  %s852_s3 = inlined_call_operand.vmem [shape: f32[8,8], index: 3, kind: input, shape index: {}]   ;;  %s853_s4 = inlined_call_operand.vmem [shape: f32[8,1], index: 4, kind: input, shape index: {}]   ;;  %s854_s5 = inlined_call_operand.hbm [shape: f32[2,8,256], index: 5, kind: output, shape index: {}]  }
   0x1   :  { %12 = vsyncpa [#allocation3 + $0x1], 0 }
   0x2   :  { %13 = vsyncpa [#allocation4], 0 }
   0x3   :  { %15 = vsyncpa [#allocation4 + $0x1], 0  ;;  %s709_s18 = smov 0   ;;  %s711_s19 = smov 0  }
   0x4   :  { %s713_s20 = smov 0   ;;  %s715_s21 = smov 0  }
   0x5   :  { %s717_s22 = smov 0   ;;  %s719_s23 = smov 0  }
   0x6 LB: > { %s479_s24 = sadd.s32 4294967295, %s676_s23   ;;  %s480_s25 = sadd.s32 4294967294, %s676_s23   ;;  %s676_s23 = sphi %s719_s23, %s21_s23   ;;  %s672_s22 = sphi %s717_s22, %s863_s22   ;;  %s668_s21 = sphi %s715_s21, %s862_s21   ;;  %s664_s20 = sphi %s713_s20, %s861_s20   ;;  %s660_s19 = sphi %s711_s19, %s860_s19   ;;  %s656_s18 = sphi %s709_s18, %s859_s18  }
   0x7   : > { %s33_s26 = sadd.s32 1, %s672_s22  ;;  %s42_s27 = sadd.s32 1, %s664_s20 }
   0x8   : > { %p35_p0 = scmp.ge.s32.totalorder %s33_s26, 2  ;;  %p49_p1 = scmp.ne.s32.totalorder %s664_s20, %s660_s19 }
   0x9   : > { %p50_p2 = scmp.eq.s32.totalorder %s676_s23, 0  ;;  %p55_p3 = scmp.ne.s32.totalorder %s660_s19, %s656_s18 }
   0xa   : > { %s865_s26 = smov (%p35_p0, %s33_s26), 0  ;;  %p56_p5 = scmp.eq.s32.totalorder %s479_s24, 0 }
   0xb   : > { %p750_p4 = por %p50_p2, %p49_p1  ;;  %s37_s29 = ssub.s32 %s672_s22, %s865_s26 }
   0xc   : > { %p165_p6 = scmp.eq.s32.totalorder %s479_s24, 1  ;;  %p40_p7 = scmp.eq.s32.totalorder %s37_s29, 0 }
   0xd   : > { %p756_p8 = por %p56_p5, %p55_p3  ;;  %p171_p10 = scmp.eq.s32.totalorder %s480_s25, 1 }
   0xe   : > { %p760_p9 = por %p165_p6, %p49_p1  ;;  %p482_p12 = scmp.ge.s32.totalorder %s676_s23, 2 }
   0xf   : > { %s765_s7 = scalar_select %p40_p7, %s664_s20, %s42_s27  }
  0x10   : > { %p767_p11 = por %p171_p10, %p55_p3  ;;  %p512_p13 = scmp.lt.s32.totalorder %s676_s23, 2 }
  0x11   : > { %s203_s9 = sand.u32 1, %s664_s20   ;;  %s498_s11 = sshll.u32 %s672_s22, 4 }
  0x12   : > { %s483_s10 = sshll.u32 %s203_s9, 4  ;;  %s214_s14 = scalar_lea.hbm %s849_s0, %s498_s11 }
  0x13   : > { %s207_s15 = scalar_lea.vmem [#allocation2], %s483_s10  ;;  %s216_s17 = sshll.u32 %s214_s14, 4  ;;  %s217_s17 = int_to_ptr.hbm [resolvable:$true] %s216_s17 }
  0x14   : > { %s218_s16 = sshll.u32 %s207_s15, 4  ;;  %p505_p0 = pnand %p512_p13, %p750_p4  ;;  %s219_s16 = int_to_ptr.vmem [resolvable:$true] %s218_s16 }
  0x15   : > { %p486_p1 = scmp.ge.s32.totalorder %s676_s23, 1  ;;  %p223_p2 = scmp.lt.s32.totalorder %s676_s23, 3 }
  0x16   : > { %s204_s24 = scalar_lea.sflag [#allocation3], %s203_s9 }
  0x17   : > { %507 = dma.hbm_to_vmem [thread:$0]  (!%p505_p0), %s217_s17, 256, %s219_s16, %s204_s24  }
  0x18   : > { %p224_p3 = pnand %p486_p1, %p223_p2 }
  0x19   : > { %s783_s25 = sand.u32 (!%p224_p3), 1, %s660_s19  }
  0x1a   : > { %227 = sbr.rel (%p224_p3) target bundleno = 309 (0x135), region = 40  ;;  %s487_s27 = sshll.u32 (!%p224_p3), %s783_s25, 4 }
  0x1b   : > { %s230_s29 = scalar_lea.sflag (!%p224_p3), [#allocation3], %s783_s25  ;;  %s233_s10 = scalar_lea.vmem (!%p224_p3), [#allocation2], %s487_s27 }
  0x1f   : > { %647 = dma.done.wait (%p756_p8), %s230_s29, 256  }
  0x20   : > { %649 = vsyncadd (%p756_p8), %s230_s29, 4294967040  ;;  %v678_v0 = vmov 0   ;;  %vm272_vm0 = vcmask 64512   ;;  %v263_v1 = vld [vmem:[%s233_s10] sm:$0xff]  ;;  %v264_v2 = vld [vmem:[%s233_s10 + $0x8] sm:$0xff]  ;;  %s499_s16 = sshll.u32 %s668_s21, 4 }
  0x21   : > { %563 = vset.pattern.permute.xlu0 %v678_v0  ;;  %v265_v3 = vld [vmem:[%s850_s1] sm:$0xff]  ;;  %291 = vmatpush.msra.mxu0 %v263_v1  ;;  %s390_s29 = scalar_lea.hbm %s854_s5, %s499_s16  ;;  %s260_s10 = scalar_lea.vmem [#allocation5], %s487_s27 }
  0x22   : > { %311 = vmatpush.msra.mxu1 %v264_v2  ;;  %v266_v4 = vld [vmem:[%s851_s2] sm:$0xff]  ;;  %489 = vmatmul.msk.f32.vlgmr.msra.gmra.mxu0 %vm272_vm0, %v265_v3  ;;  %s392_s28 = sshll.u32 %s260_s10, 4  ;;  %s394_s9 = sshll.u32 %s390_s29, 4  ;;  %s393_s28 = int_to_ptr.vmem [resolvable:$true] %s392_s28  ;;  %s395_s9 = int_to_ptr.hbm [resolvable:$true] %s394_s9 }
  0x23   : > { %490 = vmatmul.msk.f32.vlgmr.msra.gmra.mxu1 %vm272_vm0, %v265_v3  ;;  %269 = vperm.xlu0 %563, %v266_v4   ;;  %v319_v5 = vld [vmem:[%s853_s4] sm:$0xff]  ;;  %s377_s21 = scalar_lea.sflag [#allocation4], %s783_s25  ;;  %s608_s11 = sshra.s32 %s395_s9, 4  ;;  %s609_s11 = int_to_ptr.hbm [resolvable:$true] %s608_s11 }
  0x24   : > { %v318_v13 = vld [vmem:[%s852_s3] sm:$0xff]  ;;  %s610_s12 = scalar_lea.hbm %s609_s11, 16  ;;  %s614_s27 = scalar_lea.hbm %s854_s5, 32 }
  0x25   : > { %p611_p4 = scmp.ne.s32.totalorder %s609_s11, %s610_s12  ;;  %p615_p7 = scmp.lt.s32.totalorder %s609_s11, %s854_s5 }
  0x26   : > { %p616_p8 = scmp.lt.s32.totalorder %s614_s27, %s610_s12 }
  0x27   : > { %p612_p5 = pnand %p611_p4, %p760_p9 }
  0x28   : > { %p617_p10 = por %p616_p8, %p615_p7 }
  0x29   : > { %p613_p6 = pneg %p612_p5 }
  0x2b   : > { %322 = vperm.xlu0 %563, %v319_v5   ;;  %p618_p13 = pnand %p617_p10, %p613_p6 }
  0x95   : > { %v270_v6 = vpop.permute.xlu0 %269 }
  0x9d   : > { %v323_v14 = vpop.permute.xlu0 %322 }
  0x9f   : > { %v293_v7 = vpop.f32.mrf.mxu0 }
  0xa0   : > { %v313_v8 = vpop.f32.mrf.mxu1  ;;  %v294_v9 = vadd.f32 %v293_v7, %v270_v6 }
  0xa1   : > { %v314_v10 = vadd.f32 %v313_v8, %v270_v6 }
  0xa2   : > { %v316_v11 = vmax.f32 %v294_v9, 0.0 }
  0xa3   : > { %v317_v12 = vmax.f32 %v314_v10, 0.0 }
  0xa4   : > { %343 = vmatpush.msra.mxu2 %v316_v11 }
  0xa5   : > { %363 = vmatpush.msra.mxu3 %v317_v12  ;;  %491 = vmatmul.msk.f32.vlgmr.msra.gmra.mxu2 %vm272_vm0, %v318_v13 }
  0xa6   : > { %492 = vmatmul.msk.f32.vlgmr.msra.gmra.mxu3 %vm272_vm0, %v318_v13 }
 0x128   : > { %v345_v15 = vpop.f32.mrf.mxu2 }
 0x129   : > { %v365_v16 = vpop.f32.mrf.mxu3  ;;  %v346_v17 = vadd.f32 %v345_v15, %v323_v14 }
 0x12a   : > { %v366_v18 = vadd.f32 %v365_v16, %v323_v14 }
 0x12b   : > { %v368_v19 = vmax.f32 %v346_v17, 0.0 }
 0x12c   : > { %v369_v20 = vmax.f32 %v366_v18, 0.0 }
 0x12d   : > { %v370_v21 = vadd.f32 %v368_v19, %v263_v1 }
 0x12e   : > { %v371_v22 = vadd.f32 %v369_v20, %v264_v2 }
 0x12f   : > { %v372_v23 = vmax.f32 %v370_v21, 0.0 }
 0x130   : > { %v373_v24 = vmax.f32 %v371_v22, 0.0 }
 0x131   : > { %374 = vst [vmem:[%s260_s10] sm:$0xff] %v372_v23 }
 0x132   : > { %375 = vst [vmem:[%s260_s10 + $0x8] sm:$0xff] %v373_v24 }
 0x133   : > { %621 = shalt.err (!%p618_p13)
}
 0x134   : > { %502 = dma.vmem_to_hbm [thread:$0]  (%p760_p9), %s393_s28, 256, %s395_s9, %s377_s21  }
 0x135 PF: > { %s406_s25 = sand.u32 1, %s656_s18   ;;  %p509_p0 = pnand %p482_p12, %p767_p11 }
 0x136   : > { %s407_s16 = scalar_lea.sflag [#allocation4], %s406_s25 }
 0x137   : > { %p510_p1 = pneg %p509_p0 }
 0x139   : > { %651 = dma.done.wait (%p510_p1), %s407_s16, 256  }
 0x13a   : > { %653 = vsyncadd (%p510_p1), %s407_s16, 4294967040  ;;  %s21_s23 = sadd.s32 1, %s676_s23   ;;  %s859_s18 = smov %s660_s19 }
 0x13b   : > { %p18_p2 = scmp.ge.s32.totalorder %s21_s23, 4   ;;  %s860_s19 = smov %s664_s20 }
 0x13c   : > { %s861_s20 = smov %s765_s7  ;;  %s862_s21 = smov %s672_s22 }
 0x13d   : > { %s863_s22 = smov %s865_s26  ;;  %20 = sbr.rel (!%p18_p2) target bundleno = 6 (0x6), region = 85 }
 0x142   :  { %413 = vsyncpa [#allocation3], 1 }
 0x143   :  { %415 = vsyncpa [#allocation3 + $0x1], 1 }
 0x144   :  { %416 = vsyncpa [#allocation4], 1 }
 0x145   :  { %418 = vsyncpa [#allocation4 + $0x1], 1 }

</bundles_post_ra>
